<compile_context>
chip_gen: v5e
topology: v5e:2x2
jax: 0.10.0
libtpu: 0.0.40
codegen_flags: <defaults>
</compile_context>

<pallas_src>
import functools
import math
import numpy as np

import jax
import jax.numpy as jnp
from jax.experimental import pallas as pl
from jax.experimental.pallas import tpu as pltpu


# ----------------------------------------------------------------------------
# Fused forward kernel: one (Bblk, T, D) batch slab per grid step, all heads.
# ----------------------------------------------------------------------------
def _fused_mha_kernel(x_ref, wqkv_ref, bqkv_ref, wo_ref, bo_ref, o_ref,
                      *, num_heads, d_max):
    # x:(Bblk,T,D)  wqkv:(D,3*H*Dm) bf16  bqkv:(1,3*H*Dm) f32
    # wo:(H*Dm,D) bf16  bo:(1,D) f32
    H, Dm = num_heads, d_max
    HDm = H * Dm
    Bblk, T, D = x_ref.shape

    # ---- packed QKV projection: single lane-dense MXU matmul ---------------
    x = x_ref[...].reshape(Bblk * T, D).astype(jnp.bfloat16)
    qkv = jnp.dot(x, wqkv_ref[...], preferred_element_type=jnp.float32)
    qkv = qkv + bqkv_ref[...]                                  # f32 bias add
    qkv = qkv.reshape(Bblk, T, 3 * HDm).astype(jnp.bfloat16)    # MXU operands

    # ---- per-head attention (unrolled; softmax math kept in f32) -----------
    # Zero-padded q/k columns contribute 0 to scores; padded v columns map to
    # zero rows of wo — padding is mathematically exact.
    heads = []
    for h in range(H):
        q = qkv[:, :, h * Dm:(h + 1) * Dm]                      # (Bblk,T,Dm)
        k = qkv[:, :, HDm + h * Dm:HDm + (h + 1) * Dm]
        v = qkv[:, :, 2 * HDm + h * Dm:2 * HDm + (h + 1) * Dm]
        s = jnp.einsum("btm,bsm->bts", q, k,
                       preferred_element_type=jnp.float32)      # (Bblk,T,T)
        s = s - jnp.max(s, axis=-1, keepdims=True)
        p = jnp.exp(s)
        p = p * pl.reciprocal(jnp.sum(p, axis=-1, keepdims=True), approx=True)
        heads.append(jnp.einsum("bts,bsm->btm", p.astype(jnp.bfloat16), v,
                                preferred_element_type=jnp.float32))

    # ---- fused output projection: single (Bblk*T,H*Dm)@(H*Dm,D) matmul -----
    oh = jnp.concatenate(heads, axis=-1)                        # (Bblk,T,H*Dm)
    oh = oh.reshape(Bblk * T, HDm).astype(jnp.bfloat16)
    y = jnp.dot(oh, wo_ref[...], preferred_element_type=jnp.float32)
    y = y + bo_ref[...]
    o_ref[...] = y.reshape(Bblk, T, D).astype(o_ref.dtype)


# ----------------------------------------------------------------------------
# Integer head-dim allocation (parameter-only -> host numpy; mirrors the
# torch.no_grad() block: floor + top-k residual correction).
# ----------------------------------------------------------------------------
def compute_head_dims(logits_np, d_model, num_heads, min_dim):
    logits = logits_np.astype(np.float32)
    e = np.exp(logits - logits.max())
    ratios = e / e.sum()                                        # F.softmax
    hd_float = min_dim + ratios * (d_model - min_dim * num_heads)
    hd_int = np.floor(hd_float).astype(np.int64)
    diff = int(d_model - hd_int.sum())
    residuals = hd_float - np.floor(hd_float)
    if diff > 0:
        idx = np.argsort(-residuals, kind="stable")[:abs(diff)]
        hd_int[idx] += 1
    elif diff < 0:
        idx = np.argsort(residuals, kind="stable")[:abs(diff)]
        hd_int[idx] -= 1
    return hd_float, hd_int


def _pick_batch_block(B, T, target_rows=512):
    """Bblk*T rows per grid step (MXU/DMA-friendly) but keep >=2 grid steps
    when B >= 2 so both v7x TensorCores get work."""
    blk = max(1, min(B, max(1, target_rows // max(T, 1))))
    if B >= 2:
        blk = max(1, min(blk, B // 2))
    while B % blk:
        blk -= 1
    return blk


# ----------------------------------------------------------------------------
# Module wrapper
# ----------------------------------------------------------------------------
class DualLossDynamicMHAPallas:
    def __init__(self, d_model=32, num_heads=4, min_dim=4, key=None):
        assert min_dim * num_heads <= d_model
        self.d_model = d_model
        self.num_heads = num_heads
        self.min_dim = min_dim
        # TODO(synk): dropout from the PyTorch __init__ is never used in forward.

        k1, k2, k3, k4, k5 = jax.random.split(key, 5)
        self.head_weight_logits = jax.random.normal(k1, (num_heads,), jnp.float32)
        bound = 1.0 / math.sqrt(d_model)
        self.w_qkv = jax.random.uniform(k2, (d_model, 3 * d_model), jnp.float32, -bound, bound)
        self.b_qkv = jax.random.uniform(k3, (3 * d_model,), jnp.float32, -bound, bound)
        self.w_out = jax.random.uniform(k4, (d_model, d_model), jnp.float32, -bound, bound)
        self.b_out = jax.random.uniform(k5, (d_model,), jnp.float32, -bound, bound)

        # Head dims depend only on (static) parameters -> compute once on host.
        logits_np = np.asarray(self.head_weight_logits)
        self.head_dims_float, self.head_dims_int = compute_head_dims(
            logits_np, d_model, num_heads, min_dim)
        self._build_packed_weights()

    def _build_packed_weights(self):
        """Pack every head's q/k/v/out slice (zero-padded to a common Dm,
        1/sqrt(dim) folded into q) into single lane-dense weight matrices:
        W_qkv_packed:(D, 3*H*Dm), W_out_packed:(H*Dm, D).  Weights stored bf16
        (MXU-native on all generations), biases stay f32."""
        H, D = self.num_heads, self.d_model
        hd = self.head_dims_int
        offs = np.concatenate([[0], np.cumsum(hd[:-1])]).astype(np.int64)
        dmax = int(np.max(hd))
        dmax = ((dmax + 7) // 8) * 8            # multiple of 8 only (NOT 128)
        self.d_max = dmax
        HDm = H * dmax

        w_qkv = np.asarray(self.w_qkv, np.float32)
        b_qkv = np.asarray(self.b_qkv, np.float32)
        w_out = np.asarray(self.w_out, np.float32)

        wqkv = np.zeros((D, 3 * HDm), np.float32)
        bqkv = np.zeros((1, 3 * HDm), np.float32)
        wo = np.zeros((HDm, D), np.float32)
        for i in range(H):
            d_i = int(hd[i]); o_i = int(offs[i])
            scale = 1.0 / math.sqrt(d_i)
            c = i * dmax
            # q (scale folded), k, v column blocks
            wqkv[:, c:c + d_i] = w_qkv[:, o_i:o_i + d_i] * scale
            bqkv[0, c:c + d_i] = b_qkv[o_i:o_i + d_i] * scale
            wqkv[:, HDm + c:HDm + c + d_i] = w_qkv[:, D + o_i:D + o_i + d_i]
            bqkv[0, HDm + c:HDm + c + d_i] = b_qkv[D + o_i:D + o_i + d_i]
            wqkv[:, 2 * HDm + c:2 * HDm + c + d_i] = w_qkv[:, 2 * D + o_i:2 * D + o_i + d_i]
            bqkv[0, 2 * HDm + c:2 * HDm + c + d_i] = b_qkv[2 * D + o_i:2 * D + o_i + d_i]
            wo[c:c + d_i, :] = w_out[o_i:o_i + d_i, :]

        self.w_qkv_packed = jnp.asarray(wqkv, jnp.bfloat16)
        self.b_qkv_packed = jnp.asarray(bqkv, jnp.float32)
        self.w_out_packed = jnp.asarray(wo, jnp.bfloat16)
        self.b_out_2d = jnp.asarray(np.asarray(self.b_out, np.float32).reshape(1, D))

    # ---- fused Pallas forward ---------------------------------------------
    def __call__(self, query, return_aux_loss=False):
        B, T, D = query.shape
        assert D == self.d_model
        H, Dm = self.num_heads, self.d_max
        HDm = H * Dm
        b_blk = _pick_batch_block(B, T)

        kernel = functools.partial(_fused_mha_kernel, num_heads=H, d_max=Dm)
        # Weights/biases are resident across the grid (constant index_map).
        resident = lambda shape: pl.BlockSpec(shape, lambda b: (0,) * len(shape))

        output = pl.pallas_call(
            kernel,
            out_shape=jax.ShapeDtypeStruct((B, T, D), query.dtype),
            grid=(B // b_blk,),
            in_specs=[
                pl.BlockSpec((b_blk, T, D), lambda b: (b, 0, 0)),   # query slab
                resident((D, 3 * HDm)),                             # W_qkv packed (bf16)
                resident((1, 3 * HDm)),                             # b_qkv packed (f32)
                resident((HDm, D)),                                 # W_out packed (bf16)
                resident((1, D)),                                   # b_out (f32)
            ],
            out_specs=pl.BlockSpec((b_blk, T, D), lambda b: (b, 0, 0)),
            compiler_params=pltpu.CompilerParams(
                dimension_semantics=("parallel",),
                vmem_limit_bytes=48 * 1024 * 1024),
        )(query, self.w_qkv_packed, self.b_qkv_packed,
          self.w_out_packed, self.b_out_2d)

        if return_aux_loss:
            # Cheap scalar aux losses: plain JAX glue (not a hot path).
            hd_f = jnp.asarray(self.head_dims_float, jnp.float32)
            hd_i = jnp.asarray(self.head_dims_int, jnp.float32)
            float_loss = (jnp.sum(hd_f) - self.d_model) ** 2 + jnp.mean(
                jax.nn.relu(self.min_dim - hd_f))
            int_loss = jnp.mean((hd_f - hd_i) ** 2)
            return output, float_loss + 0.5 * int_loss
        return output

    # ---- pure-JAX f32 reference (mirrors the PyTorch math) -----------------
    def reference(self, query):
        B, T, D = query.shape
        qkv = query.reshape(B * T, D) @ self.w_qkv + self.b_qkv
        qkv = qkv.reshape(B, T, 3 * D)
        q_all, k_all, v_all = jnp.split(qkv, 3, axis=-1)
        outs, start = [], 0
        for i in range(self.num_heads):
            dim = int(self.head_dims_int[i])
            q = q_all[..., start:start + dim]
            k = k_all[..., start:start + dim]
            v = v_all[..., start:start + dim]
            start += dim
            s = jnp.einsum("btd,bsd->bts", q, k) / math.sqrt(dim)
            p = jax.nn.softmax(s, axis=-1)
            outs.append(jnp.einsum("bts,bsd->btd", p, v))
        o = jnp.concatenate(outs, axis=-1)
        return o @ self.w_out + self.b_out


# ----------------------------------------------------------------------------
if __name__ == "__main__":
    key = jax.random.PRNGKey(0)
    k_param, k_x = jax.random.split(key)

    # Small shapes consistent with the module forward: (B, T, d_model)
    B, T, d_model, num_heads, min_dim = 2, 8, 32, 4, 4
    module = DualLossDynamicMHAPallas(d_model=d_model, num_heads=num_heads,
                                      min_dim=min_dim, key=k_param)

    query = jax.random.normal(k_x, (B, T, d_model), jnp.float32)

    out, aux = module(query, return_aux_loss=True)
    out = jax.block_until_ready(out)
    jax.block_until_ready(aux)
    assert out.shape == (B, T, d_model)

    # Correctness vs pure-JAX f32 reference. Kernel feeds the MXU bf16
    # (f32 accumulation) -> allow bf16-level drift.
    ref = jax.block_until_ready(module.reference(query))
    np.testing.assert_allclose(np.asarray(out), np.asarray(ref), rtol=3e-2, atol=3e-2)

    print("KERNEL_OK")
</pallas_src>

<mosaic_0001>
module attributes {stable_mosaic.version = 11 : i64} {
  func.func @_fused_mha_kernel(%arg0: i32, %arg1: memref<1x8x32xf32, #tpu.memory_space<vmem>>, %arg2: memref<32x192xbf16, #tpu.memory_space<vmem>>, %arg3: memref<1x192xf32, #tpu.memory_space<vmem>>, %arg4: memref<64x32xbf16, #tpu.memory_space<vmem>>, %arg5: memref<1x32xf32, #tpu.memory_space<vmem>>, %arg6: memref<1x8x32xf32, #tpu.memory_space<vmem>>) attributes {dimension_semantics = [#tpu.dimension_semantics<parallel>], iteration_bounds = array<i64: 2>, scalar_prefetch = 0 : i64, scratch_operands = 0 : i64, tpu.core_type = #tpu.core_type<tc>, window_params = [{transform_indices = @transform_0, window_bounds = array<i64: 1, 8, 32>}, {pipeline_mode = #tpu.pipeline_mode<synchronous>, transform_indices = @transform_1, window_bounds = array<i64: 32, 192>}, {pipeline_mode = #tpu.pipeline_mode<synchronous>, transform_indices = @transform_2, window_bounds = array<i64: 1, 192>}, {pipeline_mode = #tpu.pipeline_mode<synchronous>, transform_indices = @transform_3, window_bounds = array<i64: 64, 32>}, {pipeline_mode = #tpu.pipeline_mode<synchronous>, transform_indices = @transform_4, window_bounds = array<i64: 1, 32>}, {transform_indices = @transform_5, window_bounds = array<i64: 1, 8, 32>}]} {
    %c0 = arith.constant 0 : index
    %c0_0 = arith.constant 0 : index
    %c0_1 = arith.constant 0 : index
    %0 = vector.load %arg1[%c0, %c0_0, %c0_1] : memref<1x8x32xf32, #tpu.memory_space<vmem>>, vector<1x8x32xf32>
    %1 = vector.shape_cast %0 : vector<1x8x32xf32> to vector<8x32xf32>
    %2 = arith.truncf %1 : vector<8x32xf32> to vector<8x32xbf16>
    %c0_2 = arith.constant 0 : index
    %c0_3 = arith.constant 0 : index
    %3 = vector.load %arg2[%c0_2, %c0_3] : memref<32x192xbf16, #tpu.memory_space<vmem>>, vector<32x192xbf16>
    %cst = arith.constant dense<0.000000e+00> : vector<8x192xf32>
    %4 = tpu.matmul %2, %3, %cst {dimension_numbers = #tpu.dot_dimension_numbers<[1], [0], [0], [1], [0, 0, 1, 1], [], []>} : vector<8x32xbf16>, vector<32x192xbf16>, vector<8x192xf32> -> vector<8x192xf32>
    %c0_4 = arith.constant 0 : index
    %c0_5 = arith.constant 0 : index
    %5 = vector.load %arg3[%c0_4, %c0_5] : memref<1x192xf32, #tpu.memory_space<vmem>>, vector<1x192xf32>
    %6 = vector.broadcast %5 : vector<1x192xf32> to vector<8x192xf32>
    %7 = arith.addf %4, %6 : vector<8x192xf32>
    %8 = vector.shape_cast %7 : vector<8x192xf32> to vector<1x8x192xf32>
    %9 = arith.truncf %8 : vector<1x8x192xf32> to vector<1x8x192xbf16>
    %10 = vector.extract_strided_slice %9 {offsets = [0, 0, 0], sizes = [1, 8, 16], strides = [1, 1, 1]} : vector<1x8x192xbf16> to vector<1x8x16xbf16>
    %11 = vector.extract_strided_slice %9 {offsets = [0, 0, 64], sizes = [1, 8, 16], strides = [1, 1, 1]} : vector<1x8x192xbf16> to vector<1x8x16xbf16>
    %12 = vector.extract_strided_slice %9 {offsets = [0, 0, 128], sizes = [1, 8, 16], strides = [1, 1, 1]} : vector<1x8x192xbf16> to vector<1x8x16xbf16>
    "tpu.trace_start"() <{level = 10 : i32, message = "btm,bsm->bts"}> : () -> ()
    %cst_6 = arith.constant dense<0.000000e+00> : vector<1x8x8xf32>
    %13 = tpu.matmul %10, %11, %cst_6 {dimension_numbers = #tpu.dot_dimension_numbers<[2], [2], [1], [1], [0, 0, 0, 1, 1, 1], [0], [0]>} : vector<1x8x16xbf16>, vector<1x8x16xbf16>, vector<1x8x8xf32> -> vector<1x8x8xf32>
    "tpu.trace_stop"() : () -> ()
    %cst_7 = arith.constant dense<0xFF800000> : vector<1x8xf32>
    %14 = vector.multi_reduction <maximumf>, %13, %cst_7 [2] : vector<1x8x8xf32> to vector<1x8xf32>
    %15 = vector.shape_cast %14 : vector<1x8xf32> to vector<1x8x1xf32>
    %16 = vector.broadcast %15 : vector<1x8x1xf32> to vector<1x8x8xf32>
    %17 = arith.subf %13, %16 : vector<1x8x8xf32>
    %18 = math.exp %17 : vector<1x8x8xf32>
    %cst_8 = arith.constant dense<0.000000e+00> : vector<1x8xf32>
    %19 = vector.multi_reduction <add>, %18, %cst_8 [2] : vector<1x8x8xf32> to vector<1x8xf32>
    %20 = vector.shape_cast %19 : vector<1x8xf32> to vector<1x8x1xf32>
    %21 = tpu.reciprocal %20 {approx = true} : vector<1x8x1xf32> -> vector<1x8x1xf32>
    %22 = vector.broadcast %21 : vector<1x8x1xf32> to vector<1x8x8xf32>
    %23 = arith.mulf %18, %22 : vector<1x8x8xf32>
    %24 = arith.truncf %23 : vector<1x8x8xf32> to vector<1x8x8xbf16>
    "tpu.trace_start"() <{level = 10 : i32, message = "bts,bsm->btm"}> : () -> ()
    %cst_9 = arith.constant dense<0.000000e+00> : vector<1x8x16xf32>
    %25 = tpu.matmul %24, %12, %cst_9 {dimension_numbers = #tpu.dot_dimension_numbers<[2], [1], [1], [2], [0, 0, 0, 1, 1, 2], [0], [0]>} : vector<1x8x8xbf16>, vector<1x8x16xbf16>, vector<1x8x16xf32> -> vector<1x8x16xf32>
    "tpu.trace_stop"() : () -> ()
    %26 = vector.extract_strided_slice %9 {offsets = [0, 0, 16], sizes = [1, 8, 16], strides = [1, 1, 1]} : vector<1x8x192xbf16> to vector<1x8x16xbf16>
    %27 = vector.extract_strided_slice %9 {offsets = [0, 0, 80], sizes = [1, 8, 16], strides = [1, 1, 1]} : vector<1x8x192xbf16> to vector<1x8x16xbf16>
    %28 = vector.extract_strided_slice %9 {offsets = [0, 0, 144], sizes = [1, 8, 16], strides = [1, 1, 1]} : vector<1x8x192xbf16> to vector<1x8x16xbf16>
    "tpu.trace_start"() <{level = 10 : i32, message = "btm,bsm->bts"}> : () -> ()
    %cst_10 = arith.constant dense<0.000000e+00> : vector<1x8x8xf32>
    %29 = tpu.matmul %26, %27, %cst_10 {dimension_numbers = #tpu.dot_dimension_numbers<[2], [2], [1], [1], [0, 0, 0, 1, 1, 1], [0], [0]>} : vector<1x8x16xbf16>, vector<1x8x16xbf16>, vector<1x8x8xf32> -> vector<1x8x8xf32>
    "tpu.trace_stop"() : () -> ()
    %cst_11 = arith.constant dense<0xFF800000> : vector<1x8xf32>
    %30 = vector.multi_reduction <maximumf>, %29, %cst_11 [2] : vector<1x8x8xf32> to vector<1x8xf32>
    %31 = vector.shape_cast %30 : vector<1x8xf32> to vector<1x8x1xf32>
    %32 = vector.broadcast %31 : vector<1x8x1xf32> to vector<1x8x8xf32>
    %33 = arith.subf %29, %32 : vector<1x8x8xf32>
    %34 = math.exp %33 : vector<1x8x8xf32>
    %cst_12 = arith.constant dense<0.000000e+00> : vector<1x8xf32>
    %35 = vector.multi_reduction <add>, %34, %cst_12 [2] : vector<1x8x8xf32> to vector<1x8xf32>
    %36 = vector.shape_cast %35 : vector<1x8xf32> to vector<1x8x1xf32>
    %37 = tpu.reciprocal %36 {approx = true} : vector<1x8x1xf32> -> vector<1x8x1xf32>
    %38 = vector.broadcast %37 : vector<1x8x1xf32> to vector<1x8x8xf32>
    %39 = arith.mulf %34, %38 : vector<1x8x8xf32>
    %40 = arith.truncf %39 : vector<1x8x8xf32> to vector<1x8x8xbf16>
    "tpu.trace_start"() <{level = 10 : i32, message = "bts,bsm->btm"}> : () -> ()
    %cst_13 = arith.constant dense<0.000000e+00> : vector<1x8x16xf32>
    %41 = tpu.matmul %40, %28, %cst_13 {dimension_numbers = #tpu.dot_dimension_numbers<[2], [1], [1], [2], [0, 0, 0, 1, 1, 2], [0], [0]>} : vector<1x8x8xbf16>, vector<1x8x16xbf16>, vector<1x8x16xf32> -> vector<1x8x16xf32>
    "tpu.trace_stop"() : () -> ()
    %42 = vector.extract_strided_slice %9 {offsets = [0, 0, 32], sizes = [1, 8, 16], strides = [1, 1, 1]} : vector<1x8x192xbf16> to vector<1x8x16xbf16>
    %43 = vector.extract_strided_slice %9 {offsets = [0, 0, 96], sizes = [1, 8, 16], strides = [1, 1, 1]} : vector<1x8x192xbf16> to vector<1x8x16xbf16>
    %44 = vector.extract_strided_slice %9 {offsets = [0, 0, 160], sizes = [1, 8, 16], strides = [1, 1, 1]} : vector<1x8x192xbf16> to vector<1x8x16xbf16>
    "tpu.trace_start"() <{level = 10 : i32, message = "btm,bsm->bts"}> : () -> ()
    %cst_14 = arith.constant dense<0.000000e+00> : vector<1x8x8xf32>
    %45 = tpu.matmul %42, %43, %cst_14 {dimension_numbers = #tpu.dot_dimension_numbers<[2], [2], [1], [1], [0, 0, 0, 1, 1, 1], [0], [0]>} : vector<1x8x16xbf16>, vector<1x8x16xbf16>, vector<1x8x8xf32> -> vector<1x8x8xf32>
    "tpu.trace_stop"() : () -> ()
    %cst_15 = arith.constant dense<0xFF800000> : vector<1x8xf32>
    %46 = vector.multi_reduction <maximumf>, %45, %cst_15 [2] : vector<1x8x8xf32> to vector<1x8xf32>
    %47 = vector.shape_cast %46 : vector<1x8xf32> to vector<1x8x1xf32>
    %48 = vector.broadcast %47 : vector<1x8x1xf32> to vector<1x8x8xf32>
    %49 = arith.subf %45, %48 : vector<1x8x8xf32>
    %50 = math.exp %49 : vector<1x8x8xf32>
    %cst_16 = arith.constant dense<0.000000e+00> : vector<1x8xf32>
    %51 = vector.multi_reduction <add>, %50, %cst_16 [2] : vector<1x8x8xf32> to vector<1x8xf32>
    %52 = vector.shape_cast %51 : vector<1x8xf32> to vector<1x8x1xf32>
    %53 = tpu.reciprocal %52 {approx = true} : vector<1x8x1xf32> -> vector<1x8x1xf32>
    %54 = vector.broadcast %53 : vector<1x8x1xf32> to vector<1x8x8xf32>
    %55 = arith.mulf %50, %54 : vector<1x8x8xf32>
    %56 = arith.truncf %55 : vector<1x8x8xf32> to vector<1x8x8xbf16>
    "tpu.trace_start"() <{level = 10 : i32, message = "bts,bsm->btm"}> : () -> ()
    %cst_17 = arith.constant dense<0.000000e+00> : vector<1x8x16xf32>
    %57 = tpu.matmul %56, %44, %cst_17 {dimension_numbers = #tpu.dot_dimension_numbers<[2], [1], [1], [2], [0, 0, 0, 1, 1, 2], [0], [0]>} : vector<1x8x8xbf16>, vector<1x8x16xbf16>, vector<1x8x16xf32> -> vector<1x8x16xf32>
    "tpu.trace_stop"() : () -> ()
    %58 = vector.extract_strided_slice %9 {offsets = [0, 0, 48], sizes = [1, 8, 16], strides = [1, 1, 1]} : vector<1x8x192xbf16> to vector<1x8x16xbf16>
    %59 = vector.extract_strided_slice %9 {offsets = [0, 0, 112], sizes = [1, 8, 16], strides = [1, 1, 1]} : vector<1x8x192xbf16> to vector<1x8x16xbf16>
    %60 = vector.extract_strided_slice %9 {offsets = [0, 0, 176], sizes = [1, 8, 16], strides = [1, 1, 1]} : vector<1x8x192xbf16> to vector<1x8x16xbf16>
    "tpu.trace_start"() <{level = 10 : i32, message = "btm,bsm->bts"}> : () -> ()
    %cst_18 = arith.constant dense<0.000000e+00> : vector<1x8x8xf32>
    %61 = tpu.matmul %58, %59, %cst_18 {dimension_numbers = #tpu.dot_dimension_numbers<[2], [2], [1], [1], [0, 0, 0, 1, 1, 1], [0], [0]>} : vector<1x8x16xbf16>, vector<1x8x16xbf16>, vector<1x8x8xf32> -> vector<1x8x8xf32>
    "tpu.trace_stop"() : () -> ()
    %cst_19 = arith.constant dense<0xFF800000> : vector<1x8xf32>
    %62 = vector.multi_reduction <maximumf>, %61, %cst_19 [2] : vector<1x8x8xf32> to vector<1x8xf32>
    %63 = vector.shape_cast %62 : vector<1x8xf32> to vector<1x8x1xf32>
    %64 = vector.broadcast %63 : vector<1x8x1xf32> to vector<1x8x8xf32>
    %65 = arith.subf %61, %64 : vector<1x8x8xf32>
    %66 = math.exp %65 : vector<1x8x8xf32>
    %cst_20 = arith.constant dense<0.000000e+00> : vector<1x8xf32>
    %67 = vector.multi_reduction <add>, %66, %cst_20 [2] : vector<1x8x8xf32> to vector<1x8xf32>
    %68 = vector.shape_cast %67 : vector<1x8xf32> to vector<1x8x1xf32>
    %69 = tpu.reciprocal %68 {approx = true} : vector<1x8x1xf32> -> vector<1x8x1xf32>
    %70 = vector.broadcast %69 : vector<1x8x1xf32> to vector<1x8x8xf32>
    %71 = arith.mulf %66, %70 : vector<1x8x8xf32>
    %72 = arith.truncf %71 : vector<1x8x8xf32> to vector<1x8x8xbf16>
    "tpu.trace_start"() <{level = 10 : i32, message = "bts,bsm->btm"}> : () -> ()
    %cst_21 = arith.constant dense<0.000000e+00> : vector<1x8x16xf32>
    %73 = tpu.matmul %72, %60, %cst_21 {dimension_numbers = #tpu.dot_dimension_numbers<[2], [1], [1], [2], [0, 0, 0, 1, 1, 2], [0], [0]>} : vector<1x8x8xbf16>, vector<1x8x16xbf16>, vector<1x8x16xf32> -> vector<1x8x16xf32>
    "tpu.trace_stop"() : () -> ()
    %74 = tpu.concatenate %25, %41, %57, %73 in 2 : vector<1x8x16xf32>, vector<1x8x16xf32>, vector<1x8x16xf32>, vector<1x8x16xf32> -> vector<1x8x64xf32>
    %75 = vector.shape_cast %74 : vector<1x8x64xf32> to vector<8x64xf32>
    %76 = arith.truncf %75 : vector<8x64xf32> to vector<8x64xbf16>
    %c0_22 = arith.constant 0 : index
    %c0_23 = arith.constant 0 : index
    %77 = vector.load %arg4[%c0_22, %c0_23] : memref<64x32xbf16, #tpu.memory_space<vmem>>, vector<64x32xbf16>
    %cst_24 = arith.constant dense<0.000000e+00> : vector<8x32xf32>
    %78 = tpu.matmul %76, %77, %cst_24 {dimension_numbers = #tpu.dot_dimension_numbers<[1], [0], [0], [1], [0, 0, 1, 1], [], []>} : vector<8x64xbf16>, vector<64x32xbf16>, vector<8x32xf32> -> vector<8x32xf32>
    %c0_25 = arith.constant 0 : index
    %c0_26 = arith.constant 0 : index
    %79 = vector.load %arg5[%c0_25, %c0_26] : memref<1x32xf32, #tpu.memory_space<vmem>>, vector<1x32xf32>
    %80 = vector.broadcast %79 : vector<1x32xf32> to vector<8x32xf32>
    %81 = arith.addf %78, %80 : vector<8x32xf32>
    %82 = vector.shape_cast %81 : vector<8x32xf32> to vector<1x8x32xf32>
    %c0_27 = arith.constant 0 : index
    %c0_28 = arith.constant 0 : index
    %c0_29 = arith.constant 0 : index
    %83 = vector.load %arg6[%c0_27, %c0_28, %c0_29] : memref<1x8x32xf32, #tpu.memory_space<vmem>>, vector<1x8x32xf32>
    tpu.vector_store %arg6[%c0_27, %c0_28, %c0_29], %82 {strides = array<i32>} : memref<1x8x32xf32, #tpu.memory_space<vmem>>, vector<1x8x32xf32>,
    return
  }
  func.func @transform_0(%arg0: i32) -> (i32, i32, i32) {
    %c0_i32 = arith.constant 0 : i32
    %c0_i32_0 = arith.constant 0 : i32
    %c0_i32_1 = arith.constant 0 : i32
    return %arg0, %c0_i32, %c0_i32_0 : i32, i32, i32
  }
  func.func @transform_1(%arg0: i32) -> (i32, i32) {
    %c0_i32 = arith.constant 0 : i32
    %c0_i32_0 = arith.constant 0 : i32
    %c0_i32_1 = arith.constant 0 : i32
    return %c0_i32, %c0_i32_0 : i32, i32
  }
  func.func @transform_2(%arg0: i32) -> (i32, i32) {
    %c0_i32 = arith.constant 0 : i32
    %c0_i32_0 = arith.constant 0 : i32
    %c0_i32_1 = arith.constant 0 : i32
    return %c0_i32, %c0_i32_0 : i32, i32
  }
  func.func @transform_3(%arg0: i32) -> (i32, i32) {
    %c0_i32 = arith.constant 0 : i32
    %c0_i32_0 = arith.constant 0 : i32
    %c0_i32_1 = arith.constant 0 : i32
    return %c0_i32, %c0_i32_0 : i32, i32
  }
  func.func @transform_4(%arg0: i32) -> (i32, i32) {
    %c0_i32 = arith.constant 0 : i32
    %c0_i32_0 = arith.constant 0 : i32
    %c0_i32_1 = arith.constant 0 : i32
    return %c0_i32, %c0_i32_0 : i32, i32
  }
  func.func @transform_5(%arg0: i32) -> (i32, i32, i32) {
    %c0_i32 = arith.constant 0 : i32
    %c0_i32_0 = arith.constant 0 : i32
    %c0_i32_1 = arith.constant 0 : i32
    return %arg0, %c0_i32, %c0_i32_0 : i32, i32, i32
  }
}

</mosaic_0001>

<bundles_post_ra>
// kernel: tpu_custom_call.1
= control target key start
LH: loop header
LB: loop body
LE: loop exit
PB: predicated region body
PF: predicated region fallthrough
CT: control target
= control target key end

     0   :  { %10 = vsyncpa [#allocation3], 0  ;;  %s1138_s0 = inlined_call_operand.vmem [shape: f32[2,8,32], index: 0, kind: input, shape index: {}]   ;;  %s1139_s1 = inlined_call_operand.vmem [shape: bf16[32,192], index: 1, kind: input, shape index: {}]   ;;  %s1140_s2 = inlined_call_operand.hbm [shape: f32[1,192], index: 2, kind: input, shape index: {}]   ;;  %s1141_s3 = inlined_call_operand.vmem [shape: bf16[64,32], index: 3, kind: input, shape index: {}]   ;;  %s1142_s4 = inlined_call_operand.vmem [shape: f32[1,32], index: 4, kind: input, shape index: {}]   ;;  %s1143_s5 = inlined_call_operand.hbm [shape: f32[2,8,32], index: 5, kind: output, shape index: {}]  }
   0x1   :  { %11 = vsyncpa [#allocation4], 0 }
   0x2   :  { %13 = vsyncpa [#allocation4 + $0x1], 0  ;;  %s960_s18 = smov 0   ;;  %s962_s19 = smov 0  }
   0x3   :  { %s964_s20 = smov 0   ;;  %s966_s21 = smov 0  }
   0x4 LB: > { %s981_s22 = sadd.s32 4294967295, %s920_s21   ;;  %s687_s23 = sadd.s32 4294967294, %s920_s21   ;;  %s920_s21 = sphi %s966_s21, %s1149_s21   ;;  %s916_s20 = sphi %s964_s20, %s1148_s20   ;;  %s912_s19 = sphi %s962_s19, %s1147_s19   ;;  %s908_s18 = sphi %s960_s18, %s1146_s18  }
   0x5   : > { %s985_s24 = sadd.s32 1, %s920_s21   ;;  %s136_s25 = sadd.s32 1, %s916_s20 }
   0x6   : > { %s133_s26 = ssub.s32 %s920_s21, %s985_s24  ;;  %p146_p0 = scmp.ne.s32.totalorder %s916_s20, %s912_s19 }
   0x7   : > { %p134_p1 = scmp.eq.s32.totalorder %s133_s26, 0  ;;  %p147_p2 = scmp.eq.s32.totalorder %s981_s22, 1 }
   0x8   : > { %p152_p3 = scmp.ne.s32.totalorder %s912_s19, %s908_s18  ;;  %p153_p4 = scmp.eq.s32.totalorder %s687_s23, 1 }
   0x9   : > { %s996_s27 = scalar_select %p134_p1, %s916_s20, %s136_s25  }
   0xa   : > { %p998_p5 = por %p147_p2, %p146_p0  ;;  %p1002_p6 = por %p153_p4, %p152_p3 }
   0xb   : > { %p688_p7 = scmp.ge.s32.totalorder %s920_s21, 1  ;;  %p160_p8 = scmp.lt.s32.totalorder %s920_s21, 3 }
   0xc   : > { %p764_p9 = scmp.eq.s32.totalorder %s981_s22, 0  ;;  %s175_s7 = sshll.u32 %s1140_s2, 4  ;;  %s176_s7 = int_to_ptr.hbm [resolvable:$true] %s175_s7 }
   0xd   : > { %p161_p10 = pnand %p688_p7, %p160_p8  ;;  %s922_s8 = smov [#allocation2]  }
   0xe   : > { %s177_s9 = sshll.u32 %s922_s8, 4  ;;  %s178_s9 = int_to_ptr.vmem [resolvable:$true] %s177_s9 }
   0xf   : > { %p756_p11 = pneg %p161_p10  ;;  %203 = sbr.rel (%p161_p10) target bundleno = 1480 (0x5c8), region = 40 }
  0x11   : > { %p757_p12 = pnand %p764_p9, %p756_p11 }
  0x13   : > { %759 = dma.hbm_to_vmem [thread:$0]  (!%p757_p12), %s176_s7, 32, %s178_s9, [#allocation3]  }
  0x14   : > { %899 = dma.done.wait (%p764_p9), [#allocation3], 32  }
  0x15   : > { %901 = vsyncadd (%p764_p9), [#allocation3], 4294967264  ;;  %p231_p13 = scmp.lt.s32.totalorder %s981_s22, 1  ;;  %v705_v0 = vld [vmem:[%s1139_s1 + $0x10] sm:$0xf]  ;;  %vm268_vm0 = vcmask 261120  }
  0x16   : > { %v745_v1 = vld [vmem:[%s1139_s1 + $0x14] sm:$0xf0]  ;;  %v744_v2 = vld [vmem:[%s1139_s1 + $0x14] sm:$0xf]  ;;  %v707_v4 = vld [vmem:[%s1139_s1 + $0x18] sm:$0xf0] }
  0x17   : > { %s232_s10 = scalar_select %p231_p13, %s981_s22, 1  ;;  %v706_v3 = vor.u32 %v745_v1, %v705_v0  ;;  %v697_v5 = vld [vmem:[%s1139_s1] sm:$0xf]  ;;  %v743_v6 = vld [vmem:[%s1139_s1 + $0x4] sm:$0xf0]  ;;  %v710_v7 = vor.u32 %v744_v2, %v707_v4  ;;  %vm341_vm1 = vcmask 1043456  }
  0x18   : > { %v742_v8 = vld [vmem:[%s1139_s1 + $0x4] sm:$0xf]  ;;  %v699_v9 = vld [vmem:[%s1139_s1 + $0x8] sm:$0xf0]  ;;  %v698_v10 = vor.u32 %v743_v6, %v697_v5  ;;  %v242_v14 = vld [vmem:[#allocation2] sm:$0x3] }
  0x19   : > { %s694_s11 = sshll.u32 %s232_s10, 3  ;;  %278 = vmatpush.bf16.msra.mxu0 %v706_v3  ;;  %291 = vmatpush.bf16.msra.mxu1 %v710_v7  ;;  %v702_v12 = vor.u32 %v742_v8, %v699_v9  ;;  %v244_v15 = vperm.slane %v242_v14, 0  ;;  %v245_v16 = vperm.slane %v242_v14, 1  ;;  %s923_s15 = smov 112   ;;  %vm304_vm2 = vcmask 130048  }
  0x1a   : > { %s234_s26 = scalar_lea.vmem %s1138_s0, %s694_s11  ;;  %s924_s16 = smov 64   ;;  %vm324_vm3 = vcmask 64512   ;;  %vm543_vm4 = vcmask 392192   ;;  %vm582_vm5 = vcmask 523264  }
  0x1b   : > { %v236_v11 = vld [vmem:[%s234_s26] sm:$0xff]  ;;  %s925_s17 = smov 32   ;;  %s926_s23 = smov 16  }
  0x1c   : > { %v237_v13 = vpack.c.bf16 %v236_v11, %v236_v11  ;;  %s927_s25 = smov 96   ;;  %s928_s26 = smov 80  }
  0x1d   : > { %279 = vmatpush.bf16.msra.mxu0 %v698_v10  ;;  %292 = vmatpush.bf16.msra.mxu1 %v702_v12  ;;  %s929_s30 = smov 48   ;;  %s228_s11 = sand.u32 1, %s912_s19  }
  0x1e   : > { %s874_s14 = scalar_lea.hbm %s1143_s5, 16 }
  0x20   : > { %711 = vmatmul.msk.bf16.vlgmr.msra.gmra.mxu0 %vm268_vm0, %v237_v13  ;;  %712 = vmatmul.msk.bf16.vlgmr.msra.gmra.mxu1 %vm268_vm0, %v237_v13 }
  0x9d   : > { %v281_v17 = vpop.f32.mrf.mxu0  ;;  %v294_v19 = vpop.f32.mrf.mxu1 }
  0x9e   : > { %v282_v18 = vadd.f32 %v281_v17, %v244_v15  ;;  %v295_v20 = vadd.f32 %v294_v19, %v245_v16 }
  0xa0   : > { %v1043_v21 = vpack.c.bf16 %v295_v20, %v282_v18 }
  0xa2   : > { %v300_v22 = vunpack.c.l.b16 %v1043_v21  ;;  %v337_v23 = vrot.slane %v1043_v21, 4 }
  0xa4   : > { %v301_v24 = vpack.c.b16 %v300_v22, %v300_v22  ;;  %v343_v26 = vsel %vm341_vm1, %v337_v23, 0 }
  0xa5   : > { %v283_v25 = vpop.f32.mrf.mxu0  ;;  %v296_v27 = vpop.f32.mrf.mxu1  ;;  %352 = vmatpush.bf16.msra.mxu3 %v343_v26 }
  0xa6   : > { %358 = vrot.lane.b32.xlu2 %v301_v24, %s923_s15  ;;  %302 = vrot.lane.b32.xlu0 %v301_v24, %s924_s16  ;;  %s693_s16 = sshll.u32 %s228_s11, 3 }
  0xa7   : > { %s230_s6 = scalar_lea.vmem [#allocation5], %s693_s16 }
  0xa8   : > { %s613_s7 = sshll.u32 %s230_s6, 4  ;;  %s614_s7 = int_to_ptr.vmem [resolvable:$true] %s613_s7 }
  0xae   : > { %417 = vrot.lane.b32.xlu2 %v301_v24, %s925_s17 }
  0xb6   : > { %474 = vrot.lane.b32.xlu2 %v301_v24, %s926_s23 }
  0xbe   : > { %415 = vrot.lane.b32.xlu2 %v301_v24, %s927_s25 }
  0xc6   : > { %472 = vrot.lane.b32.xlu2 %v301_v24, %s928_s26 }
 0x100   : > { %v359_v28 = vpop.permute.xlu2 %358 }
 0x108   : > { %v418_v29 = vpop.permute.xlu2 %417 }
 0x109   : > { %v423_v30 = vsel %vm304_vm2, %v418_v29, 0 }
 0x10a   : > { %432 = vmatpush.bf16.xpose.msrb.mxu1 %v423_v30 }
 0x110   : > { %v475_v31 = vpop.permute.xlu2 %474 }
 0x111   : > { %v480_v57 = vsel %vm304_vm2, %v475_v31, 0 }
 0x118   : > { %v416_v32 = vpop.permute.xlu2 %415  ;;  %v303_v33 = vpop.permute.xlu0 %302 }
 0x119   : > { %717 = vmatmul.msk.bf16.vlgmr.msrb.gmra.mxu1 %vm304_vm2, %v416_v32  ;;  %v309_v34 = vsel %vm304_vm2, %v303_v33, 0 }
 0x11a   : > { %318 = vmatpush.bf16.xpose.msra.mxu2 %v309_v34 }
 0x120   : > { %v473_v41 = vpop.permute.xlu2 %472 }
 0x121   : > { %713 = vmatmul.msk.bf16.vlgmr.msra.gmra.mxu2 %vm304_vm2, %v1043_v21 }
 0x196   : > { %v434_v35 = vpop.f32.mrf.mxu1 }
 0x197   : > { %v438_v36 = vsel %vm324_vm3, %v434_v35, -inf }
 0x198   : > { %439 = vmax.xlane.f32.xlu2 %v438_v36 }
 0x19e   : > { %v436_v37 = vpop.f32.mrf.mxu1 }
 0x1a4   : > { %v320_v38 = vpop.f32.mrf.mxu2 }
 0x1a5   : > { %v325_v39 = vsel %vm324_vm3, %v320_v38, -inf }
 0x1a6   : > { %326 = vmax.xlane.f32.xlu0 %v325_v39 }
 0x1ac   : > { %v322_v40 = vpop.f32.mrf.mxu2 }
 0x1ad   : > { %v749_v40 = vld [vmem:[%s1141_s3 + $0x18] sm:$0xff] }
 0x1ae   : > { %590 = vmatpush.bf16.msra.mxu1 %v749_v40 }
 0x1b0   : > { %450 = vrot.lane.b32.xlu2 %v1043_v21, %s927_s25 }
 0x20b   : > { %v440_v42 = vpop.xlane.xlu2 %439 }
 0x20c   : > { %v441_v60 = vsub.f32 %v434_v35, %v440_v42  ;;  %v747_v42 = vld [vmem:[%s1141_s3 + $0x8] sm:$0xff] }
 0x20e   : > { %v442_v61 = vmul.f32 1.442695, %v441_v60 }
 0x213   : > { %v451_v43 = vpop.permute.xlu2 %450 }
 0x214   : > { %v452_v44 = vrot.slane %v451_v43, 4  ;;  %v746_v43 = vld [vmem:[%s1141_s3] sm:$0xff] }
 0x216   : > { %v457_v45 = vsel %vm341_vm1, %v452_v44, 0 }
 0x217   : > { %466 = vmatpush.bf16.msrb.mxu2 %v457_v45 }
 0x219   : > { %v327_v46 = vpop.xlane.xlu0 %326 }
 0x21a   : > { %v328_v47 = vsub.f32 %v320_v38, %v327_v46 }
 0x21c   : > { %v329_v48 = vmul.f32 1.442695, %v328_v47 }
 0x21e   : > { %808 = vpow2.f32 %v329_v48 }
 0x224   : > { %v809_v49 = vpop.eup %808 }
 0x225   : > { %v331_v50 = vsel %vm324_vm3, %v809_v49, 0.0 }
 0x226   : > { %332 = vadd.xlane.f32.xlu1 %v331_v50 }
 0x23f   : > { %360 = vrot.lane.b32.xlu1 %v301_v24, %s929_s30 }
 0x299   : > { %v333_v51 = vpop.xlane.xlu1 %332 }
 0x29a   : > { %810 = vrcp.f32 %v333_v51  ;;  %v807_v51 = vld [vmem:[%s1142_s4] ss:$0 sm:$0xff] }
 0x29b   : > { %812 = vpow2.f32 %v442_v61 }
 0x2a0   : > { %v811_v52 = vpop.eup %810 }
 0x2a1   : > { %v335_v53 = vmul.f32 %v811_v52, %v809_v49  ;;  %v813_v0 = vpop.eup %812 }
 0x2a2   : > { %v444_v2 = vsel %vm324_vm3, %v813_v0, 0.0 }
 0x2a3   : > { %v336_v54 = vpack.c.bf16 %v335_v53, %v335_v53 }
 0x2a5   : > { %714 = vmatmul.msk.bf16.vlgmr.msra.gmra.mxu3 %vm324_vm3, %v336_v54 }
 0x2b1   : > { %v361_v55 = vpop.permute.xlu1 %360 }
 0x2b2   : > { %v366_v56 = vsel %vm304_vm2, %v361_v55, 0 }
 0x2b3   : > { %375 = vmatpush.bf16.xpose.msrb.mxu3 %v366_v56 }
 0x2ba   : > { %715 = vmatmul.msk.bf16.vlgmr.msrb.gmra.mxu3 %vm304_vm2, %v359_v28 }
 0x2bb   : > { %489 = vmatpush.bf16.xpose.msra.mxu3 %v480_v57 }
 0x2ca   : > { %719 = vmatmul.msk.bf16.vlgmr.msra.gmra.mxu3 %vm304_vm2, %v473_v41  ;;  %v748_v41 = vld [vmem:[%s1141_s3 + $0x10] sm:$0xff] }
 0x2cb   : > { %591 = vmatpush.bf16.msra.mxu1 %v748_v41 }
 0x2cf   : > { %592 = vmatpush.bf16.msra.mxu1 %v747_v42 }
 0x2d3   : > { %593 = vmatpush.bf16.msra.mxu1 %v746_v43 }
 0x328   : > { %v1068_v58 = vpop.f32.mrf.mxu3 }
 0x330   : > { %v356_v59 = vpop.f32.mrf.mxu3 }
 0x33d   : > { %v377_v62 = vpop.f32.mrf.mxu3 }
 0x33e   : > { %v381_v63 = vsel %vm324_vm3, %v377_v62, -inf }
 0x33f   : > { %382 = vmax.xlane.f32.xlu1 %v381_v63 }
 0x345   : > { %v379_v1 = vpop.f32.mrf.mxu3 }
 0x347   : > { %445 = vadd.xlane.f32.xlu1 %v444_v2 }
 0x34d   : > { %v491_v3 = vpop.f32.mrf.mxu3 }
 0x34e   : > { %v495_v4 = vsel %vm324_vm3, %v491_v3, -inf }
 0x34f   : > { %496 = vmax.xlane.f32.xlu0 %v495_v4 }
 0x355   : > { %v493_v5 = vpop.f32.mrf.mxu3 }
 0x363   : > { %393 = vrot.lane.b32.xlu0 %v1043_v21, %s923_s15  ;;  %s739_s15 = sshll.u32 %s981_s22, 3  ;;  %s601_s22 = scalar_lea.sflag [#allocation4], %s228_s11 }
 0x364   : > { %s611_s25 = scalar_lea.hbm %s1143_s5, %s739_s15 }
 0x365   : > { %s615_s8 = sshll.u32 %s611_s25, 4  ;;  %s616_s8 = int_to_ptr.hbm [resolvable:$true] %s615_s8 }
 0x366   : > { %s868_s9 = sshra.s32 %s616_s8, 4  ;;  %s869_s9 = int_to_ptr.hbm [resolvable:$true] %s868_s9 }
 0x367   : > { %s870_s10 = scalar_lea.hbm %s869_s9, 8  ;;  %p875_p3 = scmp.lt.s32.totalorder %s869_s9, %s1143_s5 }
 0x368   : > { %p871_p0 = scmp.ne.s32.totalorder %s869_s9, %s870_s10  ;;  %p876_p4 = scmp.lt.s32.totalorder %s874_s14, %s870_s10 }
 0x36a   : > { %p872_p1 = pnand %p871_p0, %p998_p5  ;;  %p877_p7 = por %p876_p4, %p875_p3 }
 0x36c   : > { %p873_p2 = pneg %p872_p1 }
 0x36e   : > { %p878_p8 = pnand %p877_p7, %p873_p2 }
 0x3b2   : > { %v383_v6 = vpop.xlane.xlu1 %382 }
 0x3b3   : > { %v384_v7 = vsub.f32 %v377_v62, %v383_v6 }
 0x3b5   : > { %v385_v8 = vmul.f32 1.442695, %v384_v7 }
 0x3b7   : > { %814 = vpow2.f32 %v385_v8 }
 0x3ba   : > { %v446_v9 = vpop.xlane.xlu1 %445 }
 0x3bb   : > { %816 = vrcp.f32 %v446_v9 }
 0x3bd   : > { %v815_v10 = vpop.eup %814 }
 0x3be   : > { %v387_v11 = vsel %vm324_vm3, %v815_v10, 0.0 }
 0x3bf   : > { %388 = vadd.xlane.f32.xlu0 %v387_v11 }
 0x3c1   : > { %v817_v12 = vpop.eup %816 }
 0x3c2   : > { %v448_v13 = vmul.f32 %v817_v12, %v813_v0  ;;  %v497_v14 = vpop.xlane.xlu0 %496 }
 0x3c3   : > { %v498_v15 = vsub.f32 %v491_v3, %v497_v14 }
 0x3c4   : > { %v449_v16 = vpack.c.bf16 %v448_v13, %v448_v13 }
 0x3c5   : > { %v499_v17 = vmul.f32 1.442695, %v498_v15 }
 0x3c6   : > { %718 = vmatmul.msk.bf16.vlgmr.msrb.gmra.mxu2 %vm324_vm3, %v449_v16 }
 0x3c7   : > { %818 = vpow2.f32 %v499_v17 }
 0x3cd   : > { %v819_v18 = vpop.eup %818 }
 0x3ce   : > { %v501_v19 = vsel %vm324_vm3, %v819_v18, 0.0 }
 0x3cf   : > { %502 = vadd.xlane.f32.xlu1 %v501_v19 }
 0x3d3   : > { %507 = vrot.lane.b32.xlu0 %v1043_v21, %s928_s26 }
 0x3d5   : > { %v394_v20 = vpop.permute.xlu0 %393 }
 0x3d6   : > { %v395_v22 = vrot.slane %v394_v20, 4 }
 0x3d8   : > { %v400_v23 = vsel %vm341_vm1, %v395_v22, 0 }
 0x3d9   : > { %409 = vmatpush.bf16.msrb.mxu0 %v400_v23 }
 0x432   : > { %v389_v24 = vpop.xlane.xlu0 %388 }
 0x433   : > { %820 = vrcp.f32 %v389_v24 }
 0x439   : > { %v821_v25 = vpop.eup %820 }
 0x43a   : > { %v391_v26 = vmul.f32 %v821_v25, %v815_v10 }
 0x43c   : > { %v392_v27 = vpack.c.bf16 %v391_v26, %v391_v26 }
 0x43e   : > { %716 = vmatmul.msk.bf16.vlgmr.msrb.gmra.mxu0 %vm324_vm3, %v392_v27 }
 0x442   : > { %v503_v28 = vpop.xlane.xlu1 %502 }
 0x443   : > { %822 = vrcp.f32 %v503_v28 }
 0x445   : > { %v508_v29 = vpop.permute.xlu0 %507 }
 0x446   : > { %v509_v30 = vrot.slane %v508_v29, 4 }
 0x448   : > { %v514_v31 = vsel %vm341_vm1, %v509_v30, 0 }
 0x449   : > { %v823_v32 = vpop.eup %822  ;;  %v468_v21 = vpop.f32.mrf.mxu2  ;;  %523 = vmatpush.bf16.msra.mxu0 %v514_v31 }
 0x44a   : > { %v505_v33 = vmul.f32 %v823_v32, %v819_v18  ;;  %534 = vrot.lane.b32.xlu0 %v468_v21, %s925_s17 }
 0x44c   : > { %v506_v34 = vpack.c.bf16 %v505_v33, %v505_v33 }
 0x44e   : > { %720 = vmatmul.msk.bf16.vlgmr.msra.gmra.mxu0 %vm324_vm3, %v506_v34 }
 0x451   : > { %v470_v35 = vpop.f32.mrf.mxu2 }
 0x4bb   : > { %v411_v36 = vpop.f32.mrf.mxu0 }
 0x4bc   : > { %530 = vrot.lane.b32.xlu1 %v411_v36, %s926_s23  ;;  %v535_v44 = vpop.permute.xlu0 %534 }
 0x4c3   : > { %v413_v37 = vpop.f32.mrf.mxu0 }
 0x4cb   : > { %v525_v38 = vpop.f32.mrf.mxu0 }
 0x4cc   : > { %538 = vrot.lane.b32.xlu0 %v525_v38, %s929_s30 }
 0x4d3   : > { %v527_v39 = vpop.f32.mrf.mxu0 }
 0x52e   : > { %v531_v45 = vpop.permute.xlu1 %530 }
 0x52f   : > { %v541_v46 = vsel %vm304_vm2, %v1068_v58, %v531_v45 }
 0x530   : > { %v542_v47 = vsel %vm268_vm0, %v541_v46, %v535_v44 }
 0x53e   : > { %v539_v48 = vpop.permute.xlu0 %538 }
 0x53f   : > { %v544_v49 = vsel %vm543_vm4, %v542_v47, %v539_v48 }
 0x540   : > { %v545_v50 = vpack.c.bf16 %v544_v49, %v544_v49 }
 0x542   : > { %737 = vmatmul.msk.bf16.vlgmr.msra.gmra.mxu1 %vm582_vm5, %v545_v50 }
 0x5bf   : > { %v595_v52 = vpop.f32.mrf.mxu1 }
 0x5c0   : > { %v596_v53 = vadd.f32 %v807_v51, %v595_v52 }
 0x5c2   : > { %599 = vst.msk [vmem:[%s230_s6] sm:$0xff] %vm268_vm0, %v596_v53 }
 0x5c3   : > { %881 = shalt.err (!%p878_p8)
}
 0x5c4   : > { %754 = dma.vmem_to_hbm [thread:$0]  (%p998_p5), %s614_s7, 128, %s616_s8, %s601_s22  }
 0x5c7   : > { %v597_v54 = vpop.f32.mrf.mxu1 }
 0x5c8 PF: > { %p766_p9 = scmp.ge.s32.totalorder %s920_s21, 2  ;;  %s627_s11 = sand.u32 1, %s908_s18  }
 0x5c9   : > { %s628_s17 = scalar_lea.sflag [#allocation4], %s627_s11 }
 0x5ca   : > { %p761_p10 = pnand %p766_p9, %p1002_p6 }
 0x5cc   : > { %p762_p11 = pneg %p761_p10 }
 0x5ce   : > { %903 = dma.done.wait (%p762_p11), %s628_s17, 128  }
 0x5cf   : > { %905 = vsyncadd (%p762_p11), %s628_s17, 4294967168  ;;  %p16_p12 = scmp.ge.s32.totalorder %s985_s24, 4   ;;  %s1146_s18 = smov %s912_s19 }
 0x5d0   : > { %s1147_s19 = smov %s916_s20  ;;  %s1148_s20 = smov %s996_s27 }
 0x5d1   : > { %s1149_s21 = smov %s985_s24  ;;  %18 = sbr.rel (!%p16_p12) target bundleno = 4 (0x4), region = 80 }
 0x5d6   :  { %634 = vsyncpa [#allocation3], 1 }
 0x5d7   :  { %636 = vsyncpa [#allocation3 + $0x1], 1 }
 0x5d8   :  { %637 = vsyncpa [#allocation4], 1 }
 0x5d9   :  { %639 = vsyncpa [#allocation4 + $0x1], 1 }

</bundles_post_ra>
